<compile_context>
chip_gen: v6e
topology: v6e:2x2x1
jax: 0.10.0
libtpu: 0.0.40
codegen_flags: <defaults>
</compile_context>

<pallas_src>
import functools

import jax
import jax.numpy as jnp
from jax import lax
from jax.experimental import pallas as pl
from jax.experimental.pallas import tpu as pltpu


def _bd_stats_kernel(score_ref, targ_ref, up_ref, dn_ref, out_ref, *,
                     apply_sigmoid, compute_dtype):
    """One (batch, row-tile) step -> a (1, 1, 8, 128) slab of partial stats.

    Slab rows (each broadcast over the 128 lanes; rows 4..7 are zero):
      0: sum(target)          (== S == y_sum for {0,1} targets)
      1: count(conv == 5)     (C = S - this count)
      2: sum(score * target)  (intersect)
      3: sum(score * score)   (z_sum)
    """
    f32 = jnp.float32
    t = targ_ref[0, 0].astype(compute_dtype)       # (tile_rows, W) target, channel 0
    s = score_ref[0, 0].astype(compute_dtype)      # (tile_rows, W) score,  channel 0
    if apply_sigmoid:
        # exp + reciprocal both live on the EUP slot (keeps v5e's single EUP
        # lean; neutral on v6e/v7x).
        s = pl.reciprocal(jnp.exp(-s) + 1.0, approx=True)

    th, w = t.shape

    # 3x3 cross conv with cyclic wrap.  roll(+1)+roll(-1) sums are independent
    # of the rotation direction convention; the wrapped tile edges are fixed
    # up below on narrow (1, W) slices / via the column mask only.
    conv = (t
            + pltpu.roll(t, 1, 0) + pltpu.roll(t, th - 1, 0)
            + pltpu.roll(t, 1, 1) + pltpu.roll(t, w - 1, 1))

    # Image columns 0 and W-1 can never reach conv == 5 under zero padding, so
    # exclude them from the count.  Folding the (1, W) mask into the select's
    # on-value makes the exclusion free (it just replaces the constant 1.0).
    ci = lax.broadcasted_iota(jnp.int32, (1, w), 1)
    cmask = jnp.where((ci > 0) & (ci < w - 1), 1.0, 0.0).astype(f32)   # (1, W)

    def count5(c):
        # f32 count of (c == 5), excluding the image boundary columns.
        return jnp.sum(jnp.where(c == 5, cmask, 0.0))

    if th >= 2:
        up_h = up_ref[0, 0].astype(compute_dtype)   # (1, W) image row above tile (or 0)
        dn_h = dn_ref[0, 0].astype(compute_dtype)   # (1, W) image row below tile (or 0)
        top_wrap = conv[0:1, :]
        bot_wrap = conv[th - 1:th, :]
        top_fix = top_wrap - t[th - 1:th, :] + up_h   # swap wrapped row for halo row
        bot_fix = bot_wrap - t[0:1, :] + dn_h
        n5 = (count5(conv)
              - count5(top_wrap) + count5(top_fix)
              - count5(bot_wrap) + count5(bot_fix))
    else:
        n5 = jnp.zeros((), f32)     # single image row: conv <= 3, never 5

    # {0,1} targets (one-hot masks, as produced by the reference module):
    #   S = count_nonzero(t) = sum(t) = y_sum  and  C = S - count(conv == 5).
    # TODO(synk): arbitrary-valued float targets would need the unreduced
    # Y = conv * t tile; not supported by this optimized kernel.
    sum_t = jnp.sum(t.astype(f32))
    sum_st = jnp.sum((s * t).astype(f32))
    sum_ss = jnp.sum((s * s).astype(f32))

    r8 = lax.broadcasted_iota(jnp.int32, (8, 128), 0)
    slab = (jnp.where(r8 == 0, sum_t, 0.0)
            + jnp.where(r8 == 1, n5, 0.0)
            + jnp.where(r8 == 2, sum_st, 0.0)
            + jnp.where(r8 == 3, sum_ss, 0.0))
    out_ref[...] = slab.reshape(1, 1, 8, 128)


def _vmem_capacity_bytes():
    try:
        return int(pltpu.get_tpu_info().vmem_capacity_bytes)
    except Exception:
        return 128 * 1024 * 1024            # v5e/v6e default


def _select_compute_dtype(score_dtype, target_dtype):
    """Keep the math in bf16 when both inputs are bf16 and the VPU has native
    bf16 (v6e/v7x); otherwise compute in f32 (always accumulate in f32)."""
    if (jnp.dtype(score_dtype) == jnp.bfloat16
            and jnp.dtype(target_dtype) == jnp.bfloat16):
        try:
            kind = jax.devices()[0].device_kind.lower()
        except Exception:
            kind = ""
        if any(old in kind for old in ("v2", "v3", "v4", "v5")):
            return jnp.float32              # no bf16 VALU/EUP on these parts
        return jnp.bfloat16
    return jnp.float32


def _choose_tile_rows(h, w, itemsize, batch, target_tile_bytes):
    """Largest row tile that divides H, is a multiple of 8 (or equals H) and
    keeps one input tile around `target_tile_bytes`.  With batch == 1 the tile
    is capped at ~H/2 so the (parallel, parallel) grid has >= 2 steps and both
    v7x TensorCores get work."""
    if h % 8 != 0:
        return h                            # only whole-H blocks satisfy the (8,128) rule
    max_rows = max(8, (target_tile_bytes // max(1, w * itemsize)) // 8 * 8)
    max_rows = min(max_rows, h)
    if batch == 1 and h >= 16:
        max_rows = min(max_rows, max(8, (h // 2) // 8 * 8))
    cand = max_rows
    while cand >= 8:
        if h % cand == 0:
            return cand
        cand -= 8
    return h


def _bd_partial_stats(inputs, target, *, apply_sigmoid, tile_rows):
    """Returns (B, R, 8, 128) lane-dense partial statistics."""
    B, _, H, W = target.shape

    compute_dtype = _select_compute_dtype(inputs.dtype, target.dtype)

    vmem_cap = _vmem_capacity_bytes()
    small_vmem = vmem_cap <= 64 * 1024 * 1024          # v7x-class parts
    target_tile_bytes = (2 if small_vmem else 4) * 1024 * 1024
    vmem_limit = (48 if small_vmem else 64) * 1024 * 1024

    itemsize = max(jnp.dtype(inputs.dtype).itemsize,
                   jnp.dtype(target.dtype).itemsize,
                   jnp.dtype(compute_dtype).itemsize)
    if tile_rows is not None:
        th = int(tile_rows)
        if th < 1 or H % th != 0 or (th != H and th % 8 != 0):
            raise ValueError(
                "tile_rows={} must divide H={} and be a multiple of 8 "
                "(or equal H)".format(th, H))
    else:
        th = _choose_tile_rows(H, W, itemsize, B, target_tile_bytes)
    R = H // th
    # Per-tile counts stay exact in f32 (tile elements << 2^24 at these tile
    # sizes); cross-tile count sums are done in int32 in the JAX glue.

    # Tiny halo rows (image row just above / below each row tile), gathered
    # with strided slices so the full target channel is never copied in HBM.
    tdt = target.dtype
    zrow = jnp.zeros((B, 1, W), tdt)
    if R > 1:
        up_rows = target[:, 0, th - 1:H - 1:th, :]    # rows r*th - 1, r = 1..R-1
        dn_rows = target[:, 0, th:H:th, :]            # rows (r+1)*th, r = 0..R-2
        up_halo = jnp.concatenate([zrow, up_rows], axis=1)   # (B, R, W)
        dn_halo = jnp.concatenate([dn_rows, zrow], axis=1)   # (B, R, W)
    else:
        up_halo = zrow
        dn_halo = zrow
    up_halo = up_halo.reshape(B, R, 1, W)
    dn_halo = dn_halo.reshape(B, R, 1, W)

    # Channel-0 selection happens here: the C block index is pinned to 0.
    img_spec = pl.BlockSpec((1, 1, th, W), lambda b, r: (b, 0, r, 0))
    halo_spec = pl.BlockSpec((1, 1, 1, W), lambda b, r: (b, r, 0, 0))
    out_spec = pl.BlockSpec((1, 1, 8, 128), lambda b, r: (b, r, 0, 0))

    in_bytes = B * H * W * (jnp.dtype(inputs.dtype).itemsize
                            + jnp.dtype(target.dtype).itemsize)
    halo_bytes = 2 * B * R * W * jnp.dtype(tdt).itemsize
    cost = pl.CostEstimate(
        flops=12 * B * H * W,
        transcendentals=(2 * B * H * W) if apply_sigmoid else 0,
        bytes_accessed=in_bytes + halo_bytes + B * R * 8 * 128 * 4,
    )

    kernel = functools.partial(_bd_stats_kernel, apply_sigmoid=apply_sigmoid,
                               compute_dtype=compute_dtype)
    parts = pl.pallas_call(
        kernel,
        out_shape=jax.ShapeDtypeStruct((B, R, 8, 128), jnp.float32),
        grid_spec=pltpu.PrefetchScalarGridSpec(
            num_scalar_prefetch=0,
            grid=(B, R),
            in_specs=[img_spec, img_spec, halo_spec, halo_spec],
            out_specs=out_spec,
        ),
        compiler_params=pltpu.CompilerParams(
            dimension_semantics=("parallel", "parallel"),
            vmem_limit_bytes=vmem_limit,
        ),
        cost_estimate=cost,
    )(inputs, target, up_halo, dn_halo)
    return parts


@functools.partial(jax.jit, static_argnames=("sigmoid", "tile_rows"))
def boundary_sensitive_loss(inputs, target, weight=None, sigmoid=False,
                            tile_rows=None):
    """JAX/Pallas equivalent of BoundarySensitiveLoss.forward (NCHW inputs).

    `target` is expected to be a {0,1}-valued mask (one-hot channels), exactly
    like the reference module's one-hot targets.
    """
    del weight  # unused; kept for signature parity with the PyTorch module
    assert inputs.shape == target.shape, (
        "predict {} & target {} shape do not match".format(inputs.shape,
                                                           target.shape))
    parts = _bd_partial_stats(inputs, target, apply_sigmoid=sigmoid,
                              tile_rows=tile_rows)
    lane0 = parts[:, :, :, 0]                      # (B, R, 8); all lanes identical

    # Count statistics: per-tile partials are exact f32 integers; sum them
    # across tiles in int32 so very large masks stay exact (matches torch's
    # integer count_nonzero semantics).
    s_cnt = jnp.sum(lane0[:, :, 0].astype(jnp.int32))    # S = count_nonzero(target)
    n5_cnt = jnp.sum(lane0[:, :, 1].astype(jnp.int32))   # count(conv == 5)
    c_cnt = s_cnt - n5_cnt                                # C after Y[Y == 5] = 0

    intersect = jnp.sum(lane0[:, :, 2])
    z_sum = jnp.sum(lane0[:, :, 3])
    S = s_cnt.astype(jnp.float32)
    C = c_cnt.astype(jnp.float32)
    y_sum = S                                             # sum(t*t) == sum(t) for {0,1} t

    smooth = jnp.float32(1e-05)
    alpha = 1.0 - (C + smooth) / (S + smooth)
    alpha = 2.0 * alpha - 1.0
    alpha = jnp.minimum(alpha, jnp.float32(0.8))
    loss = (z_sum + y_sum - 2.0 * intersect + smooth) / (
        z_sum + y_sum - (1.0 + alpha) * intersect + smooth)
    return loss


if __name__ == "__main__":
    key = jax.random.PRNGKey(0)
    k1, k2 = jax.random.split(key)

    B, C, H, W = 2, 4, 16, 16
    # Predicted probabilities in [0, 1].
    inputs = jax.random.uniform(k1, (B, C, H, W), dtype=jnp.float32)
    # One-hot {0,1} mask target, as the loss expects.
    labels = jax.random.randint(k2, (B, H, W), 0, C)
    target = (labels[:, None, :, :] == jnp.arange(C)[None, :, None, None]
              ).astype(jnp.float32)

    # tile_rows=8 exercises the row-tiled (halo fixup) path even at this small
    # size; tile_rows=None auto-picks generation-aware row tiles.
    loss = boundary_sensitive_loss(inputs, target, tile_rows=8)
    loss_sig = boundary_sensitive_loss(inputs, target, sigmoid=True)
    jax.block_until_ready((loss, loss_sig))
    print("KERNEL_OK")
</pallas_src>

<mosaic_0001>
module attributes {stable_mosaic.version = 11 : i64} {
  func.func @_bd_stats_kernel(%arg0: i32, %arg1: i32, %arg2: memref<1x1x8x16xf32, #tpu.memory_space<vmem>>, %arg3: memref<1x1x8x16xf32, #tpu.memory_space<vmem>>, %arg4: memref<1x1x1x16xf32, #tpu.memory_space<vmem>>, %arg5: memref<1x1x1x16xf32, #tpu.memory_space<vmem>>, %arg6: memref<1x1x8x128xf32, #tpu.memory_space<vmem>>) attributes {dimension_semantics = [#tpu.dimension_semantics<parallel>, #tpu.dimension_semantics<parallel>], iteration_bounds = array<i64: 2, 2>, scalar_prefetch = 0 : i64, scratch_operands = 0 : i64, tpu.core_type = #tpu.core_type<tc>, window_params = [{transform_indices = @transform_0, window_bounds = array<i64: 1, 1, 8, 16>}, {transform_indices = @transform_1, window_bounds = array<i64: 1, 1, 8, 16>}, {transform_indices = @transform_2, window_bounds = array<i64: 1, 1, 1, 16>}, {transform_indices = @transform_3, window_bounds = array<i64: 1, 1, 1, 16>}, {transform_indices = @transform_4, window_bounds = array<i64: 1, 1, 8, 128>}]} {
    %c0 = arith.constant 0 : index
    %c0_0 = arith.constant 0 : index
    %c0_1 = arith.constant 0 : index
    %c0_2 = arith.constant 0 : index
    %0 = vector.load %arg3[%c0, %c0_0, %c0_1, %c0_2] : memref<1x1x8x16xf32, #tpu.memory_space<vmem>>, vector<1x1x8x16xf32>
    %1 = vector.shape_cast %0 : vector<1x1x8x16xf32> to vector<8x16xf32>
    %c0_3 = arith.constant 0 : index
    %c0_4 = arith.constant 0 : index
    %c0_5 = arith.constant 0 : index
    %c0_6 = arith.constant 0 : index
    %2 = vector.load %arg2[%c0_3, %c0_4, %c0_5, %c0_6] : memref<1x1x8x16xf32, #tpu.memory_space<vmem>>, vector<1x1x8x16xf32>
    %3 = vector.shape_cast %2 : vector<1x1x8x16xf32> to vector<8x16xf32>
    %c1_i32 = arith.constant 1 : i32
    %4 = tpu.dynamic_rotate %1 by %c1_i32 dim 0 : vector<8x16xf32>, i32 -> vector<8x16xf32>
    %5 = arith.addf %1, %4 : vector<8x16xf32>
    %c7_i32 = arith.constant 7 : i32
    %6 = tpu.dynamic_rotate %1 by %c7_i32 dim 0 : vector<8x16xf32>, i32 -> vector<8x16xf32>
    %7 = arith.addf %5, %6 : vector<8x16xf32>
    %c1_i32_7 = arith.constant 1 : i32
    %8 = tpu.dynamic_rotate %1 by %c1_i32_7 dim 1 : vector<8x16xf32>, i32 -> vector<8x16xf32>
    %9 = arith.addf %7, %8 : vector<8x16xf32>
    %c15_i32 = arith.constant 15 : i32
    %10 = tpu.dynamic_rotate %1 by %c15_i32 dim 1 : vector<8x16xf32>, i32 -> vector<8x16xf32>
    %11 = arith.addf %9, %10 : vector<8x16xf32>
    %12 = tpu.iota {dimensions = array<i32: 1>} : vector<1x16xi32>
    %c0_i32 = arith.constant 0 : i32
    %13 = vector.broadcast %c0_i32 : i32 to vector<1x16xi32>
    %14 = arith.cmpi sgt, %12, %13 : vector<1x16xi32>
    %c15_i32_8 = arith.constant 15 : i32
    %15 = vector.broadcast %c15_i32_8 : i32 to vector<1x16xi32>
    %16 = arith.cmpi slt, %12, %15 : vector<1x16xi32>
    %17 = arith.andi %14, %16 : vector<1x16xi1>
    %cst = arith.constant 1.000000e+00 : f32
    %cst_9 = arith.constant 0.000000e+00 : f32
    %18 = vector.broadcast %cst : f32 to vector<1x16xf32>
    %19 = vector.broadcast %cst_9 : f32 to vector<1x16xf32>
    %20 = arith.select %17, %18, %19 : vector<1x16xi1>, vector<1x16xf32>
    %c0_10 = arith.constant 0 : index
    %c0_11 = arith.constant 0 : index
    %c0_12 = arith.constant 0 : index
    %c0_13 = arith.constant 0 : index
    %21 = vector.load %arg4[%c0_10, %c0_11, %c0_12, %c0_13] : memref<1x1x1x16xf32, #tpu.memory_space<vmem>>, vector<1x1x1x16xf32>
    %22 = vector.shape_cast %21 : vector<1x1x1x16xf32> to vector<1x16xf32>
    %c0_14 = arith.constant 0 : index
    %c0_15 = arith.constant 0 : index
    %c0_16 = arith.constant 0 : index
    %c0_17 = arith.constant 0 : index
    %23 = vector.load %arg5[%c0_14, %c0_15, %c0_16, %c0_17] : memref<1x1x1x16xf32, #tpu.memory_space<vmem>>, vector<1x1x1x16xf32>
    %24 = vector.shape_cast %23 : vector<1x1x1x16xf32> to vector<1x16xf32>
    %25 = vector.extract_strided_slice %11 {offsets = [0, 0], sizes = [1, 16], strides = [1, 1]} : vector<8x16xf32> to vector<1x16xf32>
    %26 = vector.extract_strided_slice %11 {offsets = [7, 0], sizes = [1, 16], strides = [1, 1]} : vector<8x16xf32> to vector<1x16xf32>
    %27 = vector.extract_strided_slice %1 {offsets = [7, 0], sizes = [1, 16], strides = [1, 1]} : vector<8x16xf32> to vector<1x16xf32>
    %28 = arith.subf %25, %27 : vector<1x16xf32>
    %29 = arith.addf %28, %22 : vector<1x16xf32>
    %30 = vector.extract_strided_slice %1 {offsets = [0, 0], sizes = [1, 16], strides = [1, 1]} : vector<8x16xf32> to vector<1x16xf32>
    %31 = arith.subf %26, %30 : vector<1x16xf32>
    %32 = arith.addf %31, %24 : vector<1x16xf32>
    %cst_18 = arith.constant 5.000000e+00 : f32
    %33 = vector.broadcast %cst_18 : f32 to vector<8x16xf32>
    %34 = arith.cmpf oeq, %11, %33 : vector<8x16xf32>
    %cst_19 = arith.constant 0.000000e+00 : f32
    %35 = vector.shape_cast %20 : vector<1x16xf32> to vector<1x16xf32>
    %36 = vector.broadcast %35 : vector<1x16xf32> to vector<8x16xf32>
    %37 = vector.broadcast %cst_19 : f32 to vector<8x16xf32>
    %38 = arith.select %34, %36, %37 : vector<8x16xi1>, vector<8x16xf32>
    %39 = vector.shape_cast %38 : vector<8x16xf32> to vector<1x8x16xf32>
    %cst_20 = arith.constant dense<0.000000e+00> : vector<1xf32>
    %40 = vector.multi_reduction <add>, %39, %cst_20 [1, 2] : vector<1x8x16xf32> to vector<1xf32>
    %41 = vector.shape_cast %40 : vector<1xf32> to vector<1x1x1xf32>
    %42 = vector.extract %41[0, 0, 0] : f32 from vector<1x1x1xf32>
    %cst_21 = arith.constant 5.000000e+00 : f32
    %43 = vector.broadcast %cst_21 : f32 to vector<1x16xf32>
    %44 = arith.cmpf oeq, %25, %43 : vector<1x16xf32>
    %cst_22 = arith.constant 0.000000e+00 : f32
    %45 = vector.broadcast %cst_22 : f32 to vector<1x16xf32>
    %46 = arith.select %44, %20, %45 : vector<1x16xi1>, vector<1x16xf32>
    %47 = vector.shape_cast %46 : vector<1x16xf32> to vector<1x1x16xf32>
    %cst_23 = arith.constant dense<0.000000e+00> : vector<1xf32>
    %48 = vector.multi_reduction <add>, %47, %cst_23 [1, 2] : vector<1x1x16xf32> to vector<1xf32>
    %49 = vector.shape_cast %48 : vector<1xf32> to vector<1x1x1xf32>
    %50 = vector.extract %49[0, 0, 0] : f32 from vector<1x1x1xf32>
    %51 = arith.subf %42, %50 : f32
    %cst_24 = arith.constant 5.000000e+00 : f32
    %52 = vector.broadcast %cst_24 : f32 to vector<1x16xf32>
    %53 = arith.cmpf oeq, %29, %52 : vector<1x16xf32>
    %cst_25 = arith.constant 0.000000e+00 : f32
    %54 = vector.broadcast %cst_25 : f32 to vector<1x16xf32>
    %55 = arith.select %53, %20, %54 : vector<1x16xi1>, vector<1x16xf32>
    %56 = vector.shape_cast %55 : vector<1x16xf32> to vector<1x1x16xf32>
    %cst_26 = arith.constant dense<0.000000e+00> : vector<1xf32>
    %57 = vector.multi_reduction <add>, %56, %cst_26 [1, 2] : vector<1x1x16xf32> to vector<1xf32>
    %58 = vector.shape_cast %57 : vector<1xf32> to vector<1x1x1xf32>
    %59 = vector.extract %58[0, 0, 0] : f32 from vector<1x1x1xf32>
    %60 = arith.addf %51, %59 : f32
    %cst_27 = arith.constant 5.000000e+00 : f32
    %61 = vector.broadcast %cst_27 : f32 to vector<1x16xf32>
    %62 = arith.cmpf oeq, %26, %61 : vector<1x16xf32>
    %cst_28 = arith.constant 0.000000e+00 : f32
    %63 = vector.broadcast %cst_28 : f32 to vector<1x16xf32>
    %64 = arith.select %62, %20, %63 : vector<1x16xi1>, vector<1x16xf32>
    %65 = vector.shape_cast %64 : vector<1x16xf32> to vector<1x1x16xf32>
    %cst_29 = arith.constant dense<0.000000e+00> : vector<1xf32>
    %66 = vector.multi_reduction <add>, %65, %cst_29 [1, 2] : vector<1x1x16xf32> to vector<1xf32>
    %67 = vector.shape_cast %66 : vector<1xf32> to vector<1x1x1xf32>
    %68 = vector.extract %67[0, 0, 0] : f32 from vector<1x1x1xf32>
    %69 = arith.subf %60, %68 : f32
    %cst_30 = arith.constant 5.000000e+00 : f32
    %70 = vector.broadcast %cst_30 : f32 to vector<1x16xf32>
    %71 = arith.cmpf oeq, %32, %70 : vector<1x16xf32>
    %cst_31 = arith.constant 0.000000e+00 : f32
    %72 = vector.broadcast %cst_31 : f32 to vector<1x16xf32>
    %73 = arith.select %71, %20, %72 : vector<1x16xi1>, vector<1x16xf32>
    %74 = vector.shape_cast %73 : vector<1x16xf32> to vector<1x1x16xf32>
    %cst_32 = arith.constant dense<0.000000e+00> : vector<1xf32>
    %75 = vector.multi_reduction <add>, %74, %cst_32 [1, 2] : vector<1x1x16xf32> to vector<1xf32>
    %76 = vector.shape_cast %75 : vector<1xf32> to vector<1x1x1xf32>
    %77 = vector.extract %76[0, 0, 0] : f32 from vector<1x1x1xf32>
    %78 = arith.addf %69, %77 : f32
    %79 = vector.shape_cast %1 : vector<8x16xf32> to vector<1x8x16xf32>
    %cst_33 = arith.constant dense<0.000000e+00> : vector<1xf32>
    %80 = vector.multi_reduction <add>, %79, %cst_33 [1, 2] : vector<1x8x16xf32> to vector<1xf32>
    %81 = vector.shape_cast %80 : vector<1xf32> to vector<1x1x1xf32>
    %82 = vector.extract %81[0, 0, 0] : f32 from vector<1x1x1xf32>
    %83 = arith.mulf %3, %1 : vector<8x16xf32>
    %84 = vector.shape_cast %83 : vector<8x16xf32> to vector<1x8x16xf32>
    %cst_34 = arith.constant dense<0.000000e+00> : vector<1xf32>
    %85 = vector.multi_reduction <add>, %84, %cst_34 [1, 2] : vector<1x8x16xf32> to vector<1xf32>
    %86 = vector.shape_cast %85 : vector<1xf32> to vector<1x1x1xf32>
    %87 = vector.extract %86[0, 0, 0] : f32 from vector<1x1x1xf32>
    %88 = arith.mulf %3, %3 : vector<8x16xf32>
    %89 = vector.shape_cast %88 : vector<8x16xf32> to vector<1x8x16xf32>
    %cst_35 = arith.constant dense<0.000000e+00> : vector<1xf32>
    %90 = vector.multi_reduction <add>, %89, %cst_35 [1, 2] : vector<1x8x16xf32> to vector<1xf32>
    %91 = vector.shape_cast %90 : vector<1xf32> to vector<1x1x1xf32>
    %92 = vector.extract %91[0, 0, 0] : f32 from vector<1x1x1xf32>
    %93 = tpu.iota {dimensions = array<i32: 0>} : vector<8x128xi32>
    %c0_i32_36 = arith.constant 0 : i32
    %94 = vector.broadcast %c0_i32_36 : i32 to vector<8x128xi32>
    %95 = arith.cmpi eq, %93, %94 : vector<8x128xi32>
    %cst_37 = arith.constant 0.000000e+00 : f32
    %96 = vector.broadcast %82 : f32 to vector<8x128xf32>
    %97 = vector.broadcast %cst_37 : f32 to vector<8x128xf32>
    %98 = arith.select %95, %96, %97 : vector<8x128xi1>, vector<8x128xf32>
    %c1_i32_38 = arith.constant 1 : i32
    %99 = vector.broadcast %c1_i32_38 : i32 to vector<8x128xi32>
    %100 = arith.cmpi eq, %93, %99 : vector<8x128xi32>
    %cst_39 = arith.constant 0.000000e+00 : f32
    %101 = vector.broadcast %78 : f32 to vector<8x128xf32>
    %102 = vector.broadcast %cst_39 : f32 to vector<8x128xf32>
    %103 = arith.select %100, %101, %102 : vector<8x128xi1>, vector<8x128xf32>
    %104 = arith.addf %98, %103 : vector<8x128xf32>
    %c2_i32 = arith.constant 2 : i32
    %105 = vector.broadcast %c2_i32 : i32 to vector<8x128xi32>
    %106 = arith.cmpi eq, %93, %105 : vector<8x128xi32>
    %cst_40 = arith.constant 0.000000e+00 : f32
    %107 = vector.broadcast %87 : f32 to vector<8x128xf32>
    %108 = vector.broadcast %cst_40 : f32 to vector<8x128xf32>
    %109 = arith.select %106, %107, %108 : vector<8x128xi1>, vector<8x128xf32>
    %110 = arith.addf %104, %109 : vector<8x128xf32>
    %c3_i32 = arith.constant 3 : i32
    %111 = vector.broadcast %c3_i32 : i32 to vector<8x128xi32>
    %112 = arith.cmpi eq, %93, %111 : vector<8x128xi32>
    %cst_41 = arith.constant 0.000000e+00 : f32
    %113 = vector.broadcast %92 : f32 to vector<8x128xf32>
    %114 = vector.broadcast %cst_41 : f32 to vector<8x128xf32>
    %115 = arith.select %112, %113, %114 : vector<8x128xi1>, vector<8x128xf32>
    %116 = arith.addf %110, %115 : vector<8x128xf32>
    %117 = vector.shape_cast %116 : vector<8x128xf32> to vector<1x1x8x128xf32>
    %c0_42 = arith.constant 0 : index
    %c0_43 = arith.constant 0 : index
    %c0_44 = arith.constant 0 : index
    %c0_45 = arith.constant 0 : index
    %118 = vector.load %arg6[%c0_42, %c0_43, %c0_44, %c0_45] : memref<1x1x8x128xf32, #tpu.memory_space<vmem>>, vector<1x1x8x128xf32>
    tpu.vector_store %arg6[%c0_42, %c0_43, %c0_44, %c0_45], %117 {strides = array<i32>} : memref<1x1x8x128xf32, #tpu.memory_space<vmem>>, vector<1x1x8x128xf32>,
    return
  }
  func.func @transform_0(%arg0: i32, %arg1: i32) -> (i32, i32, i32, i32) {
    %c0_i32 = arith.constant 0 : i32
    %c0_i32_0 = arith.constant 0 : i32
    %c0_i32_1 = arith.constant 0 : i32
    return %arg0, %c0_i32, %arg1, %c0_i32_0 : i32, i32, i32, i32
  }
  func.func @transform_1(%arg0: i32, %arg1: i32) -> (i32, i32, i32, i32) {
    %c0_i32 = arith.constant 0 : i32
    %c0_i32_0 = arith.constant 0 : i32
    %c0_i32_1 = arith.constant 0 : i32
    return %arg0, %c0_i32, %arg1, %c0_i32_0 : i32, i32, i32, i32
  }
  func.func @transform_2(%arg0: i32, %arg1: i32) -> (i32, i32, i32, i32) {
    %c0_i32 = arith.constant 0 : i32
    %c0_i32_0 = arith.constant 0 : i32
    %c0_i32_1 = arith.constant 0 : i32
    return %arg0, %arg1, %c0_i32, %c0_i32_0 : i32, i32, i32, i32
  }
  func.func @transform_3(%arg0: i32, %arg1: i32) -> (i32, i32, i32, i32) {
    %c0_i32 = arith.constant 0 : i32
    %c0_i32_0 = arith.constant 0 : i32
    %c0_i32_1 = arith.constant 0 : i32
    return %arg0, %arg1, %c0_i32, %c0_i32_0 : i32, i32, i32, i32
  }
  func.func @transform_4(%arg0: i32, %arg1: i32) -> (i32, i32, i32, i32) {
    %c0_i32 = arith.constant 0 : i32
    %c0_i32_0 = arith.constant 0 : i32
    %c0_i32_1 = arith.constant 0 : i32
    return %arg0, %arg1, %c0_i32, %c0_i32_0 : i32, i32, i32, i32
  }
}

</mosaic_0001>

<bundles_post_ra>
// kernel: boundary_sensitive_loss.1
= control target key start
LH: loop header
LB: loop body
LE: loop exit
PB: predicated region body
PF: predicated region fallthrough
CT: control target
= control target key end

     0   :  { %9 = vsyncpa [#allocation3], 0  ;;  %s1114_s0 = inlined_call_operand.hbm [shape: f32[2,4,16,16], index: 0, kind: input, shape index: {}]   ;;  %s1115_s1 = inlined_call_operand.hbm [shape: f32[2,4,16,16], index: 1, kind: input, shape index: {}]   ;;  %s1116_s2 = inlined_call_operand.vmem [shape: f32[2,2,1,16], index: 2, kind: input, shape index: {}]   ;;  %s1117_s3 = inlined_call_operand.vmem [shape: f32[2,2,1,16], index: 3, kind: input, shape index: {}]   ;;  %s1118_s4 = inlined_call_operand.vmem [shape: f32[2,2,8,128], index: 4, kind: output, shape index: {}]  }
   0x1   :  { %11 = vsyncpa [#allocation3 + $0x1], 0 }
   0x2   :  { %12 = vsyncpa [#allocation5], 0 }
   0x3   :  { %14 = vsyncpa [#allocation5 + $0x1], 0  ;;  %s923_s15 = smov 0   ;;  %s925_s16 = smov 0  }
   0x4   :  { %s927_s17 = smov 0   ;;  %s929_s18 = smov 0  }
   0x5   :  { %s931_s19 = smov 0   ;;  %s933_s20 = smov 0  }
   0x6   :  { %s935_s21 = smov 0   ;;  %s937_s22 = smov 0  }
   0x7 LB: > { %s648_s23 = sadd.s32 4294967295, %s890_s22   ;;  %s29_s24 = sadd.s32 1, %s882_s20  ;;  %s890_s22 = sphi %s937_s22, %s20_s22   ;;  %s886_s21 = sphi %s935_s21, %s1129_s21   ;;  %s882_s20 = sphi %s933_s20, %s1128_s20   ;;  %s878_s19 = sphi %s931_s19, %s1127_s19   ;;  %s874_s18 = sphi %s929_s18, %s1126_s18   ;;  %s870_s17 = sphi %s927_s17, %s1125_s17   ;;  %s866_s16 = sphi %s925_s16, %s1124_s16   ;;  %s862_s15 = sphi %s923_s15, %s1123_s15  }
   0x8   : > { %p30_p0 = scmp.ge.s32.totalorder %s29_s24, 2  ;;  %s32_s25 = sadd.s32 1, %s886_s21 }
   0x9   : > { %s41_s26 = sadd.s32 1, %s870_s17  ;;  %p48_p1 = scmp.ne.s32.totalorder %s870_s17, %s866_s16 }
   0xa   : > { %s1131_s24 = smov (%p30_p0, %s29_s24), 0  ;;  %s1133_s25 = smov (!%p30_p0, %s32_s25), %s886_s21 }
   0xb   : > { %s37_s27 = ssub.s32 %s882_s20, %s1131_s24  ;;  %p49_p2 = scmp.eq.s32.totalorder %s890_s22, 0 }
   0xc   : > { %p34_p3 = scmp.ge.s32.totalorder %s1133_s25, 2  ;;  %p54_p4 = scmp.ne.s32.totalorder %s866_s16, %s862_s15 }
   0xd   : > { %p974_p5 = por %p49_p2, %p48_p1  ;;  %p55_p6 = scmp.eq.s32.totalorder %s648_s23, 0 }
   0xe   : > { %s1135_s25 = smov (%p34_p3, %s1133_s25), 0  ;;  %p695_p8 = scmp.lt.s32.totalorder %s890_s22, 4 }
   0xf   : > { %p980_p7 = por %p55_p6, %p54_p4  ;;  %s36_s30 = ssub.s32 %s886_s21, %s1135_s25 }
  0x10   : > { %s38_s5 = sor.u32 %s37_s27, %s36_s30  ;;  %s988_s6 = sand.u32 1, %s870_s17  }
  0x11   : > { %p39_p9 = scmp.eq.s32.totalorder %s38_s5, 0  ;;  %s652_s7 = sshll.u32 %s988_s6, 3 }
  0x12   : > { %s653_s8 = sshll.u32 %s886_s21, 3  ;;  %s194_s12 = scalar_lea.vmem [#allocation2], %s652_s7 }
  0x13   : > { %s993_s9 = scalar_select %p39_p9, %s870_s17, %s41_s26  }
  0x14   : > { %s199_s10 = sadd.s32 %s882_s20, %s653_s8  ;;  %s203_s13 = sshll.u32 %s194_s12, 4  ;;  %s204_s13 = int_to_ptr.vmem [resolvable:$true] %s203_s13 }
  0x15   : > { %s654_s11 = sshll.u32 %s199_s10, 7  ;;  %p1005_p10 = pnand %p695_p8, %p974_p5 }
  0x16   : > { %s201_s23 = scalar_lea.hbm %s1114_s0, %s654_s11  ;;  %p658_p11 = scmp.ge.s32.totalorder %s890_s22, 1 }
  0x17   : > { %p248_p12 = scmp.lt.s32.totalorder %s890_s22, 5  ;;  %s191_s26 = scalar_lea.sflag [#allocation3], %s988_s6 }
  0x18   : > { %p766_p13 = pneg %p1005_p10  ;;  %s777_s30 = scalar_lea.vmem %s204_s13, 128 }
  0x19   : > { %p778_p0 = scmp.ne.s32.totalorder %s204_s13, %s777_s30  ;;  %s892_s5 = smov [#allocation2]  }
  0x1a   : > { %s782_s28 = sshll.u32 %s892_s5, 4  ;;  %s783_s28 = int_to_ptr.vmem [resolvable:$false] %s782_s28 }
  0x1b   : > { %p780_p1 = pnand %p778_p0, %p766_p13  ;;  %s784_s8 = scalar_lea.vmem %s783_s28, 256 }
  0x1c   : > { %p785_p3 = scmp.lt.s32.totalorder %s204_s13, %s783_s28  ;;  %p786_p4 = scmp.lt.s32.totalorder %s784_s8, %s777_s30 }
  0x1d   : > { %p781_p2 = pneg %p780_p1 }
  0x1e   : > { %p787_p5 = por %p786_p4, %p785_p3 }
  0x20   : > { %p788_p6 = pnand %p787_p5, %p781_p2 }
  0x22   : > { %791 = shalt.err (!%p788_p6)
}
  0x23   : > { %691 = dma.hbm_to_vmem [thread:$0]  (!%p1005_p10), %s201_s23, 128, %s204_s13, %s191_s26  }
  0x24   : > { %p1023_p8 = pnand %p658_p11, %p248_p12  ;;  %s221_s15 = scalar_lea.hbm %s1115_s1, %s654_s11 }
  0x25   : > { %s214_s30 = scalar_lea.vmem [#allocation4], %s652_s7  ;;  %s211_s28 = scalar_lea.sflag [#allocation5], %s988_s6 }
  0x26   : > { %s223_s5 = sshll.u32 %s214_s30, 4  ;;  %s893_s13 = smov [#allocation4]   ;;  %s224_s5 = int_to_ptr.vmem [resolvable:$true] %s223_s5 }
  0x27   : > { %s805_s8 = scalar_lea.vmem %s224_s5, 128  ;;  %s810_s23 = sshll.u32 %s893_s13, 4  ;;  %s811_s23 = int_to_ptr.vmem [resolvable:$false] %s810_s23 }
  0x28   : > { %p806_p9 = scmp.ne.s32.totalorder %s224_s5, %s805_s8  ;;  %s812_s26 = scalar_lea.vmem %s811_s23, 256 }
  0x29   : > { %p813_p11 = scmp.lt.s32.totalorder %s224_s5, %s811_s23  ;;  %p814_p12 = scmp.lt.s32.totalorder %s812_s26, %s805_s8 }
  0x2a   : > { %p808_p0 = pnand %p806_p9, %p766_p13 }
  0x2b   : > { %p815_p2 = por %p814_p12, %p813_p11 }
  0x2c   : > { %p809_p1 = pneg %p808_p0 }
  0x2e   : > { %p816_p3 = pnand %p815_p2, %p809_p1 }
  0x30   : > { %819 = shalt.err (!%p816_p3)
}
  0x31   : > { %694 = dma.hbm_to_vmem [thread:$0]  (!%p1005_p10), %s221_s15, 128, %s224_s5, %s211_s28  }
  0x32   : > { %252 = sbr.rel (%p1023_p8) target bundleno = 636 (0x27c), region = 36  ;;  %s254_s6 = sand.u32 (!%p1023_p8), 1, %s866_s16  }
  0x33   : > { %s659_s7 = sshll.u32 (!%p1023_p8), %s254_s6, 3  ;;  %s255_s11 = scalar_lea.sflag (!%p1023_p8), [#allocation3], %s254_s6 }
  0x34   : > { %s1041_s12 = scalar_lea.vmem (!%p1023_p8), [#allocation2], %s659_s7 }
  0x37   : > { %853 = dma.done.wait (%p980_p7), %s255_s11, 128  }
  0x38   : > { %855 = vsyncadd (%p980_p7), %s255_s11, 4294967168  ;;  %s264_s14 = scalar_lea.sflag [#allocation5], %s254_s6  ;;  %s267_s30 = scalar_lea.vmem [#allocation4], %s659_s7 }
  0x39   : > { %857 = dma.done.wait (%p980_p7), %s264_s14, 128  }
  0x3a   : > { %859 = vsyncadd (%p980_p7), %s264_s14, 4294967168  ;;  %v1051_v0 = vld [vmem:[%s267_s30] sm:$0xff]  ;;  %s894_s27 = smov 16   ;;  %vm342_vm0 = vcmask 1047680   ;;  %s895_s10 = smov 113   ;;  %v358_v6 = vlaneseq  ;;  %v897_v15 = vmov 0.0  }
  0x3b   : > { %343 = vrot.lane.b32.xlu0 %v1051_v0, %s894_s27  ;;  %s896_s29 = smov 127   ;;  %p314_p7 = scmp.lt.s32.totalorder %s878_s19, 1  ;;  %v338_v5 = vrot.slane %v1051_v0, 7  ;;  %v340_v8 = vrot.slane %v1051_v0, 1  ;;  %vm394_vm4 = vcmask 122880   ;;  %vm383_vm5 = vcmask 130048  }
  0x3c   : > { %p316_p10 = scmp.lt.s32.totalorder %s874_s18, 1  ;;  %v359_v9 = vand.u32 127, %v358_v6  ;;  %v337_v26 = vld [vmem:[%s1041_s12] sm:$0xff]  ;;  %v449_v36 = vsel %vm383_vm5, %v1051_v0, 0.0 }
  0x3d   : > { %s1137_s19 = smov (!%p314_p7, %s878_s19), 1  ;;  %v339_v7 = vadd.f32 %v338_v5, %v1051_v0  ;;  %v459_v32 = vmul.f32 %v337_v26, %v1051_v0  ;;  %v470_v37 = vmul.f32 %v337_v26, %v337_v26 }
  0x3e   : > { %s1139_s18 = smov (!%p316_p10, %s874_s18), 1  ;;  %s661_s15 = sshll.u32 %s1137_s19, 1  ;;  %vm360_vm1 = vcmp.gt.s32.totalorder %v359_v9, 0  ;;  %vm361_vm2 = vcmp.lt.s32.totalorder %v359_v9, 15 }
  0x3f   : > { %v341_v10 = vadd.f32 %v340_v8, %v339_v7  ;;  %s1064_s5 = sadd.s32 %s661_s15, %s1139_s18  ;;  %vm362_vm3 = vmand %vm360_vm1, %vm361_vm2  ;;  %v460_v35 = vsel %vm383_vm5, %v459_v32, 0.0  ;;  %v471_v38 = vsel %vm383_vm5, %v470_v37, 0.0  ;;  %v482_v32 = vshrl.u32 %v358_v6, 7 }
  0x40   : > { %s320_s13 = scalar_lea.vmem %s1116_s2, %s1064_s5  ;;  %s327_s6 = scalar_lea.vmem %s1117_s3, %s1064_s5  ;;  %v363_v16 = vsel %vm362_vm3, 1.0, %v897_v15 }
  0x41   : > { %v364_v17 = vld [vmem:[%s320_s13] sm:$0x1]  ;;  %vm486_vm9 = vcmp.eq.s32.totalorder %v482_v32, 1  ;;  %vm483_vm10 = vcmp.eq.s32.totalorder %v482_v32, 0  ;;  %vm490_vm11 = vcmp.eq.s32.totalorder %v482_v32, 2  ;;  %s664_s28 = sshll.u32 %s1064_s5, 3 }
  0x42   : > { %v665_v18 = vld [vmem:[%s327_s6] ss:$0 sm:$0xff]  ;;  %vm494_vm12 = vcmp.eq.s32.totalorder %v482_v32, 3  ;;  %s335_s26 = scalar_lea.vmem %s1118_s4, %s664_s28 }
  0xad   : > { %v344_v1 = vpop.permute.xlu0 %343 }
  0xae   : > { %v345_v2 = vsel %vm342_vm0, %v344_v1, %v1051_v0 }
  0xaf   : > { %346 = vrot.lane.b32.xlu0 %v345_v2, %s894_s27 }
 0x121   : > { %v347_v3 = vpop.permute.xlu0 %346 }
 0x122   : > { %v348_v4 = vsel %vm342_vm0, %v347_v3, %v1051_v0 }
 0x123   : > { %350 = vrot.lane.b32.xlu1 %v348_v4, %s895_s10 }
 0x127   : > { %354 = vrot.lane.b32.xlu1 %v348_v4, %s896_s29 }
 0x195   : > { %v351_v11 = vpop.permute.xlu1 %350 }
 0x196   : > { %v353_v12 = vadd.f32 %v351_v11, %v341_v10 }
 0x199   : > { %v355_v13 = vpop.permute.xlu1 %354 }
 0x19a   : > { %v357_v14 = vadd.f32 %v355_v13, %v353_v12 }
 0x19c   : > { %v373_v19 = vsub.f32 %v357_v14, %v340_v8  ;;  %vm381_vm6 = vcmp.eq.f32.partialorder %v357_v14, 5.0  ;;  %v369_v20 = vsub.f32 %v357_v14, %v338_v5 }
 0x19d   : > { %v382_v21 = vsel %vm381_vm6, %v363_v16, 0.0 }
 0x19e   : > { %v395_v22 = vsel %vm394_vm4, %v382_v21, 0.0  ;;  %v384_v23 = vsel %vm383_vm5, %v382_v21, 0.0  ;;  %v370_v24 = vadd.f32 %v369_v20, %v364_v17  ;;  %v380_v25 = vadd.f32 %v665_v18, %v373_v19 }
 0x19f   : > { %396 = vadd.xlane.f32.xlu1 %v395_v22  ;;  %385 = vadd.xlane.f32.xlu0 %v384_v23  ;;  %v420_v31 = vrot.slane %v382_v21, 7 }
 0x1a0   : > { %vm406_vm7 = vcmp.eq.f32.partialorder %v370_v24, 5.0  ;;  %vm433_vm8 = vcmp.eq.f32.partialorder %v380_v25, 5.0 }
 0x1a1   : > { %v407_v27 = vsel %vm406_vm7, %v363_v16, 0.0  ;;  %v434_v28 = vsel %vm433_vm8, %v363_v16, 0.0  ;;  %v422_v34 = vsel %vm394_vm4, %v420_v31, 0.0 }
 0x1a2   : > { %v408_v29 = vsel %vm394_vm4, %v407_v27, 0.0  ;;  %v436_v30 = vrot.slane %v434_v28, 7 }
 0x1a3   : > { %409 = vadd.xlane.f32.xlu0 %v408_v29 }
 0x1a4   : > { %v438_v33 = vsel %vm394_vm4, %v436_v30, 0.0 }
 0x1a5   : > { %439 = vadd.xlane.f32.xlu1 %v438_v33 }
 0x1a7   : > { %423 = vadd.xlane.f32.xlu0 %v422_v34 }
 0x1a9   : > { %461 = vadd.xlane.f32.xlu1 %v460_v35 }
 0x1ab   : > { %450 = vadd.xlane.f32.xlu0 %v449_v36 }
 0x1af   : > { %472 = vadd.xlane.f32.xlu0 %v471_v38 }
 0x228   : > { %v397_v39 = vpop.xlane.xlu1 %396  ;;  %v386_v40 = vpop.xlane.xlu0 %385 }
 0x229   : > { %v398_v41 = vrot.slane %v397_v39, 4  ;;  %v387_v42 = vrot.slane %v386_v40, 4 }
 0x22b   : > { %v399_v43 = vadd.f32 %v398_v41, %v397_v39  ;;  %v388_v44 = vadd.f32 %v387_v42, %v386_v40 }
 0x22c   : > { %v410_v45 = vpop.xlane.xlu0 %409 }
 0x22d   : > { %v400_v46 = vrot.slane %v399_v43, 2  ;;  %v389_v47 = vrot.slane %v388_v44, 2  ;;  %v411_v48 = vrot.slane %v410_v45, 4 }
 0x22e   : > { %v440_v49 = vpop.xlane.xlu1 %439 }
 0x22f   : > { %v412_v50 = vadd.f32 %v411_v48, %v410_v45  ;;  %v441_v51 = vrot.slane %v440_v49, 4  ;;  %v390_v52 = vadd.f32 %v389_v47, %v388_v44  ;;  %v401_v53 = vadd.f32 %v400_v46, %v399_v43 }
 0x230   : > { %v424_v54 = vpop.xlane.xlu0 %423 }
 0x231   : > { %v413_v55 = vrot.slane %v412_v50, 2  ;;  %v442_v56 = vadd.f32 %v441_v51, %v440_v49  ;;  %v425_v57 = vrot.slane %v424_v54, 4  ;;  %v391_v58 = vrot.slane %v390_v52, 1 }
 0x232   : > { %v462_v59 = vpop.xlane.xlu1 %461  ;;  %v402_v60 = vrot.slane %v401_v53, 1 }
 0x233   : > { %v443_v61 = vrot.slane %v442_v56, 2  ;;  %v426_v62 = vadd.f32 %v425_v57, %v424_v54  ;;  %v463_v63 = vrot.slane %v462_v59, 4  ;;  %v392_v0 = vadd.f32 %v391_v58, %v390_v52 }
 0x234   : > { %v451_v1 = vpop.xlane.xlu0 %450  ;;  %v403_v2 = vadd.f32 %v402_v60, %v401_v53  ;;  %v414_v3 = vadd.f32 %v413_v55, %v412_v50 }
 0x235   : > { %v427_v4 = vrot.slane %v426_v62, 2  ;;  %v464_v5 = vadd.f32 %v463_v63, %v462_v59  ;;  %v452_v7 = vrot.slane %v451_v1, 4  ;;  %668 = vpush %v392_v0  ;;  %v444_v8 = vadd.f32 %v443_v61, %v442_v56 }
 0x236   : > { %670 = vpush %v403_v2  ;;  %v415_v9 = vrot.slane %v414_v3, 1 }
 0x237   : > { %v465_v10 = vrot.slane %v464_v5, 2  ;;  %v453_v11 = vadd.f32 %v452_v7, %v451_v1  ;;  %v428_v12 = vadd.f32 %v427_v4, %v426_v62  ;;  %v445_v15 = vrot.slane %v444_v8, 1 }
 0x238   : > { %v473_v13 = vpop.xlane.xlu0 %472  ;;  %v416_v14 = vadd.f32 %v415_v9, %v414_v3 }
 0x239   : > { %v466_v16 = vadd.f32 %v465_v10, %v464_v5  ;;  %v454_v17 = vrot.slane %v453_v11, 2  ;;  %v474_v18 = vrot.slane %v473_v13, 4  ;;  %v429_v19 = vrot.slane %v428_v12, 1 }
 0x23a   : > { %672 = vpush %v416_v14  ;;  %v446_v23 = vadd.f32 %v445_v15, %v444_v8 }
 0x23b   : > { %v475_v20 = vadd.f32 %v474_v18, %v473_v13  ;;  %v430_v21 = vadd.f32 %v429_v19, %v428_v12  ;;  %v455_v22 = vadd.f32 %v454_v17, %v453_v11  ;;  %v467_v24 = vrot.slane %v466_v16, 1 }
 0x23d   : > { %v476_v25 = vrot.slane %v475_v20, 2  ;;  %674 = vpush %v430_v21  ;;  %v456_v26 = vrot.slane %v455_v22, 1  ;;  %v468_v29 = vadd.f32 %v467_v24, %v466_v16 }
 0x23e   : > { %676 = vpush %v446_v23 }
 0x23f   : > { %v477_v27 = vadd.f32 %v476_v25, %v475_v20  ;;  %v457_v28 = vadd.f32 %v456_v26, %v455_v22 }
 0x241   : > { %678 = vpush %v457_v28  ;;  %v478_v30 = vrot.slane %v477_v27, 1 }
 0x242   : > { %680 = vpush %v468_v29 }
 0x243   : > { %v479_v31 = vadd.f32 %v478_v30, %v477_v27 }
 0x245   : > { %682 = vpush %v479_v31 }
 0x266   : > { %s669_s18 = spop %668 }
 0x267   : > { %s671_s19 = spop %670 }
 0x268   : > { %s405_s7 = ssub.f32 %s669_s18, %s671_s19 }
 0x26b   : > { %s673_s11 = spop %672 }
 0x26c   : > { %s418_s12 = sadd.f32 %s673_s11, %s405_s7 }
 0x26e   : > { %s675_s14 = spop %674 }
 0x26f   : > { %s432_s30 = ssub.f32 %s418_s12, %s675_s14  ;;  %s677_s27 = spop %676 }
 0x271   : > { %s448_s10 = sadd.f32 %s677_s27, %s432_s30 }
 0x272   : > { %s679_s29 = spop %678 }
 0x273   : > { %v487_v33 = vstv %s448_s10  ;;  %v484_v34 = vstv %s679_s29  ;;  %s681_s15 = spop %680 }
 0x274   : > { %v488_v35 = vsel %vm486_vm9, %v487_v33, 0.0  ;;  %v485_v36 = vsel %vm483_vm10, %v484_v34, 0.0  ;;  %v491_v37 = vstv %s681_s15 }
 0x275   : > { %v489_v38 = vadd.f32 %v488_v35, %v485_v36  ;;  %v492_v39 = vsel %vm490_vm11, %v491_v37, 0.0 }
 0x276   : > { %s683_s8 = spop %682 }
 0x277   : > { %v493_v6 = vadd.f32 %v492_v39, %v489_v38  ;;  %v495_v40 = vstv %s683_s8 }
 0x278   : > { %v496_v41 = vsel %vm494_vm12, %v495_v40, 0.0 }
 0x279   : > { %v497_v42 = vadd.f32 %v496_v41, %v493_v6 }
 0x27b   : > { %498 = vst [vmem:[%s335_s26] sm:$0xff] %v497_v42 }
 0x27c PF: > { %s20_s22 = sadd.s32 1, %s890_s22   ;;  %s1123_s15 = smov %s866_s16 }
 0x27d   : > { %p17_p13 = scmp.ge.s32.totalorder %s20_s22, 6   ;;  %s1124_s16 = smov %s870_s17 }
 0x27e   : > { %s1125_s17 = smov %s993_s9  ;;  %s1126_s18 = smov %s882_s20 }
 0x27f   : > { %s1127_s19 = smov %s886_s21  ;;  %s1128_s20 = smov %s1131_s24 }
 0x280   : > { %s1129_s21 = smov %s1135_s25  ;;  %19 = sbr.rel (!%p17_p13) target bundleno = 7 (0x7), region = 95 }
 0x285   :  { %526 = vsyncpa [#allocation3], 1 }
 0x286   :  { %528 = vsyncpa [#allocation3 + $0x1], 1 }
 0x287   :  { %529 = vsyncpa [#allocation5], 1 }
 0x288   :  { %531 = vsyncpa [#allocation5 + $0x1], 1 }

</bundles_post_ra>
